<compile_context>
chip_gen: v6e
topology: v6e:2x2x1
jax: 0.10.0
libtpu: 0.0.40
codegen_flags: <defaults>
</compile_context>

<pallas_src>
import functools

import jax
import jax.numpy as jnp
from jax.experimental import pallas as pl
from jax.experimental.pallas import tpu as pltpu


LANE = 128  # weight / hidden-activation feature dims are padded to 128 lanes


def _round_up(n, m):
    return ((n + m - 1) // m) * m


def _cdiv(a, b):
    return -(-a // b)


def _choose_batch_tiling(batch, max_block_batch):
    """Pick (tile_batch, num_tiles) for the batch grid axis.

    * tiny batches: one tile (splitting would not amortise per-step overhead).
    * otherwise: an even number of tiles (both v7x TensorCores get work on the
      "parallel" batch axis), each tile as large as possible up to the cap.
    """
    max_block_batch = max(8, int(max_block_batch))
    b8 = _round_up(max(batch, 1), 8)          # sublane granularity
    if b8 < 256:
        return b8, 1
    n = max(2, _cdiv(b8, max_block_batch))
    if n % 2:
        n += 1                                 # keep the grid even for v7x's 2 TCs
    tb = _round_up(_cdiv(b8, n), 8)
    return tb, n


def _make_kernel(in_dim, num_classes, num_layers):
    """Fused forward: zero-extend x to 128 lanes, then 7 matmuls (+bias, ReLU)."""

    def kernel(x_ref, *refs):
        wb_refs = refs[: 2 * num_layers]
        o_ref = refs[2 * num_layers]
        xpad_ref = refs[2 * num_layers + 1]     # VMEM scratch (tb, LANE) f32

        # Zero-extend the real input lanes to the 128-lane matmul width inside
        # VMEM.  The pad lanes are explicit zeros every step (scratch contents
        # are otherwise unspecified, and on v7x each TensorCore owns its own
        # scratch), so the zero-padded W1 rows never see NaN/Inf garbage.
        xpad_ref[...] = jnp.zeros_like(xpad_ref)
        xpad_ref[:, :in_dim] = x_ref[...]
        h = xpad_ref[...]                        # (tb, LANE) f32

        for li in range(num_layers):
            w_ref = wb_refs[2 * li]
            b_ref = wb_refs[2 * li + 1]
            # MXU operands may be bf16; accumulate / bias / ReLU stay f32.
            # (bf16 path re-casts the activations before every matmul, so
            # rounding error compounds layer-to-layer -- bounded, documented.)
            y = jnp.dot(h.astype(w_ref.dtype), w_ref[...],
                        preferred_element_type=jnp.float32)
            y = y + b_ref[...]
            h = jnp.maximum(y, 0.0) if li < num_layers - 1 else y

        # Store only the real output columns (masked vst, but ~21x fewer HBM
        # bytes than a 128-lane-padded output + post-kernel slice).
        o_ref[...] = h[:, :num_classes].astype(o_ref.dtype)

    return kernel


@functools.partial(jax.jit, static_argnames=("block_batch", "weight_dtype"))
def mlp_forward(x, params, block_batch=512, weight_dtype=jnp.bfloat16):
    """params: list of 7 (W, b) with W shaped (in, out), b shaped (1, out)."""
    batch, in_dim = x.shape
    num_layers = len(params)
    num_classes = params[-1][0].shape[1]

    dims = [in_dim] + [w.shape[1] for (w, _) in params]
    pdims = [_round_up(d, LANE) for d in dims]

    tb, n_tiles = _choose_batch_tiling(batch, block_batch)
    batch_pad = tb * n_tiles

    # Batch padding only (12 columns wide -> cheap); no lane padding of x.
    x_f32 = x.astype(jnp.float32)
    if batch_pad != batch:
        x_f32 = jnp.pad(x_f32, ((0, batch_pad - batch), (0, 0)))

    flat_inputs = [x_f32]
    # x block: last dim == full array dim (legal even though 12 < 128).
    in_specs = [pl.BlockSpec((tb, in_dim), lambda i: (i, 0))]

    # Weights / biases zero-padded to 128-lane multiples (so every contraction
    # dim is MXU-aligned and activation pad lanes are exact zeros); constant
    # index_maps keep them VMEM-resident across all batch tiles.
    for li, (w, b) in enumerate(params):
        pin, pout = pdims[li], pdims[li + 1]
        w_p = jnp.zeros((pin, pout), weight_dtype)
        w_p = w_p.at[:w.shape[0], :w.shape[1]].set(w.astype(weight_dtype))
        b_p = jnp.zeros((1, pout), jnp.float32)
        b_p = b_p.at[:, :b.shape[-1]].set(b.reshape(1, -1).astype(jnp.float32))
        flat_inputs += [w_p, b_p]
        in_specs += [
            pl.BlockSpec((pin, pout), lambda i: (0, 0)),   # resident weights
            pl.BlockSpec((1, pout), lambda i: (0, 0)),     # resident bias
        ]

    # Output at its real width: no 128-lane padded store, no post-kernel slice.
    out_specs = pl.BlockSpec((tb, num_classes), lambda i: (i, 0))

    # VMEM budget (lane-padded physical sizes): resident params (x2 default
    # buffers) + double-buffered x/out tiles + activation temporaries +
    # scratch, with 2x headroom; cap 56 MiB (< v7x 64 MiB physical), floor 16 MiB.
    wbytes = jnp.dtype(weight_dtype).itemsize
    param_bytes = 2 * sum(pdims[i] * pdims[i + 1] * wbytes + pdims[i + 1] * 4
                          for i in range(num_layers))
    io_bytes = 2 * 2 * tb * LANE * 4          # x & out tiles, double-buffered
    act_bytes = 6 * tb * LANE * 4             # live f32 layer temporaries
    scratch_bytes = tb * LANE * 4
    vmem_limit = int(min(56 * 1024 * 1024,
                         max(16 * 1024 * 1024,
                             2 * (param_bytes + io_bytes + act_bytes
                                  + scratch_bytes))))

    out = pl.pallas_call(
        _make_kernel(in_dim, num_classes, num_layers),
        out_shape=jax.ShapeDtypeStruct((batch_pad, num_classes), jnp.float32),
        grid=(n_tiles,),
        in_specs=in_specs,
        out_specs=out_specs,
        scratch_shapes=[pltpu.VMEM((tb, LANE), jnp.float32)],
        compiler_params=pltpu.CompilerParams(
            dimension_semantics=("parallel",),   # batch tiles split across TCs
            vmem_limit_bytes=vmem_limit),
    )(*flat_inputs)

    return out[:batch] if batch_pad != batch else out


def make_params(key, input_size, f1, f2, f3, f4, f5, f6, num_classes):
    """Deterministic synthetic parameters (PyTorch-style uniform init).

    Weights stored as (in, out) so the kernel computes x @ W + b directly.
    """
    dims = [input_size, f1, f2, f3, f4, f5, f6, num_classes]
    params = []
    for i in range(7):
        fan_in, fan_out = dims[i], dims[i + 1]
        key, kw, kb = jax.random.split(key, 3)
        bound = 1.0 / (fan_in ** 0.5)
        w = jax.random.uniform(kw, (fan_in, fan_out), jnp.float32, -bound, bound)
        b = jax.random.uniform(kb, (1, fan_out), jnp.float32, -bound, bound)
        params.append((w, b))
    return params


def mlp_reference(x, params):
    h = x
    for i, (w, b) in enumerate(params):
        h = h @ w + b
        if i < len(params) - 1:
            h = jnp.maximum(h, 0.0)
    return h


if __name__ == "__main__":
    input_size = 12
    num_classes = 6
    f1 = f2 = f3 = f4 = f5 = f6 = 32

    key = jax.random.PRNGKey(0)
    key, kx = jax.random.split(key)
    params = make_params(key, input_size, f1, f2, f3, f4, f5, f6, num_classes)

    # --- run 1: tiny batch (single tile), f32 weights, tight tolerance -------
    x_small = jax.random.normal(kx, (8, input_size), jnp.float32)
    out = jax.block_until_ready(
        mlp_forward(x_small, params, weight_dtype=jnp.float32))
    ref = mlp_reference(x_small, params)
    assert out.shape == (8, num_classes)
    assert jnp.allclose(out, ref, atol=1e-5, rtol=1e-5), "f32 mismatch vs reference"

    # --- run 2: batch 256 -> even grid of 2 "parallel" tiles (both v7x TCs),
    #     default bfloat16 weights with f32 accumulation ----------------------
    key, kx2 = jax.random.split(key)
    x_big = jax.random.normal(kx2, (256, input_size), jnp.float32)
    out_bf16 = jax.block_until_ready(mlp_forward(x_big, params))
    ref_big = mlp_reference(x_big, params)
    assert out_bf16.shape == (256, num_classes)
    assert jnp.allclose(out_bf16, ref_big, atol=1e-1, rtol=1e-1), \
        "bf16 mismatch vs reference"

    print("KERNEL_OK")
</pallas_src>

<mosaic_0001>
module attributes {stable_mosaic.version = 11 : i64} {
  func.func @kernel(%arg0: i32, %arg1: memref<8x12xf32, #tpu.memory_space<vmem>>, %arg2: memref<128x128xf32, #tpu.memory_space<vmem>>, %arg3: memref<1x128xf32, #tpu.memory_space<vmem>>, %arg4: memref<128x128xf32, #tpu.memory_space<vmem>>, %arg5: memref<1x128xf32, #tpu.memory_space<vmem>>, %arg6: memref<128x128xf32, #tpu.memory_space<vmem>>, %arg7: memref<1x128xf32, #tpu.memory_space<vmem>>, %arg8: memref<128x128xf32, #tpu.memory_space<vmem>>, %arg9: memref<1x128xf32, #tpu.memory_space<vmem>>, %arg10: memref<128x128xf32, #tpu.memory_space<vmem>>, %arg11: memref<1x128xf32, #tpu.memory_space<vmem>>, %arg12: memref<128x128xf32, #tpu.memory_space<vmem>>, %arg13: memref<1x128xf32, #tpu.memory_space<vmem>>, %arg14: memref<128x128xf32, #tpu.memory_space<vmem>>, %arg15: memref<1x128xf32, #tpu.memory_space<vmem>>, %arg16: memref<8x6xf32, #tpu.memory_space<vmem>>, %arg17: memref<8x128xf32, #tpu.memory_space<vmem>>) attributes {dimension_semantics = [#tpu.dimension_semantics<parallel>], iteration_bounds = array<i64: 1>, scalar_prefetch = 0 : i64, scratch_operands = 1 : i64, tpu.core_type = #tpu.core_type<tc>, window_params = [{transform_indices = @transform_0, window_bounds = array<i64: 8, 12>}, {pipeline_mode = #tpu.pipeline_mode<synchronous>, transform_indices = @transform_1, window_bounds = array<i64: 128, 128>}, {pipeline_mode = #tpu.pipeline_mode<synchronous>, transform_indices = @transform_2, window_bounds = array<i64: 1, 128>}, {pipeline_mode = #tpu.pipeline_mode<synchronous>, transform_indices = @transform_3, window_bounds = array<i64: 128, 128>}, {pipeline_mode = #tpu.pipeline_mode<synchronous>, transform_indices = @transform_4, window_bounds = array<i64: 1, 128>}, {pipeline_mode = #tpu.pipeline_mode<synchronous>, transform_indices = @transform_5, window_bounds = array<i64: 128, 128>}, {pipeline_mode = #tpu.pipeline_mode<synchronous>, transform_indices = @transform_6, window_bounds = array<i64: 1, 128>}, {pipeline_mode = #tpu.pipeline_mode<synchronous>, transform_indices = @transform_7, window_bounds = array<i64: 128, 128>}, {pipeline_mode = #tpu.pipeline_mode<synchronous>, transform_indices = @transform_8, window_bounds = array<i64: 1, 128>}, {pipeline_mode = #tpu.pipeline_mode<synchronous>, transform_indices = @transform_9, window_bounds = array<i64: 128, 128>}, {pipeline_mode = #tpu.pipeline_mode<synchronous>, transform_indices = @transform_10, window_bounds = array<i64: 1, 128>}, {pipeline_mode = #tpu.pipeline_mode<synchronous>, transform_indices = @transform_11, window_bounds = array<i64: 128, 128>}, {pipeline_mode = #tpu.pipeline_mode<synchronous>, transform_indices = @transform_12, window_bounds = array<i64: 1, 128>}, {pipeline_mode = #tpu.pipeline_mode<synchronous>, transform_indices = @transform_13, window_bounds = array<i64: 128, 128>}, {pipeline_mode = #tpu.pipeline_mode<synchronous>, transform_indices = @transform_14, window_bounds = array<i64: 1, 128>}, {transform_indices = @transform_15, window_bounds = array<i64: 8, 6>}]} {
    %cst = arith.constant 0.000000e+00 : f32
    %0 = vector.broadcast %cst : f32 to vector<8x128xf32>
    %c0 = arith.constant 0 : index
    %c0_0 = arith.constant 0 : index
    %1 = vector.load %arg17[%c0, %c0_0] : memref<8x128xf32, #tpu.memory_space<vmem>>, vector<8x128xf32>
    tpu.vector_store %arg17[%c0, %c0_0], %0 {strides = array<i32>} : memref<8x128xf32, #tpu.memory_space<vmem>>, vector<8x128xf32>,
    %c0_1 = arith.constant 0 : index
    %c0_2 = arith.constant 0 : index
    %2 = vector.load %arg1[%c0_1, %c0_2] : memref<8x12xf32, #tpu.memory_space<vmem>>, vector<8x12xf32>
    %c0_3 = arith.constant 0 : index
    %c0_4 = arith.constant 0 : index
    %3 = vector.load %arg17[%c0_3, %c0_4] : memref<8x128xf32, #tpu.memory_space<vmem>>, vector<8x12xf32>
    tpu.vector_store %arg17[%c0_3, %c0_4], %2 {strides = array<i32>} : memref<8x128xf32, #tpu.memory_space<vmem>>, vector<8x12xf32>,
    %c0_5 = arith.constant 0 : index
    %c0_6 = arith.constant 0 : index
    %4 = vector.load %arg17[%c0_5, %c0_6] : memref<8x128xf32, #tpu.memory_space<vmem>>, vector<8x128xf32>
    %c0_7 = arith.constant 0 : index
    %c0_8 = arith.constant 0 : index
    %5 = vector.load %arg2[%c0_7, %c0_8] : memref<128x128xf32, #tpu.memory_space<vmem>>, vector<128x128xf32>
    %cst_9 = arith.constant dense<0.000000e+00> : vector<8x128xf32>
    %6 = tpu.matmul %4, %5, %cst_9 {dimension_numbers = #tpu.dot_dimension_numbers<[1], [0], [0], [1], [0, 0, 1, 1], [], []>} : vector<8x128xf32>, vector<128x128xf32>, vector<8x128xf32> -> vector<8x128xf32>
    %c0_10 = arith.constant 0 : index
    %c0_11 = arith.constant 0 : index
    %7 = vector.load %arg3[%c0_10, %c0_11] : memref<1x128xf32, #tpu.memory_space<vmem>>, vector<1x128xf32>
    %8 = vector.broadcast %7 : vector<1x128xf32> to vector<8x128xf32>
    %9 = arith.addf %6, %8 : vector<8x128xf32>
    %cst_12 = arith.constant 0.000000e+00 : f32
    %10 = vector.broadcast %cst_12 : f32 to vector<8x128xf32>
    %11 = arith.maximumf %9, %10 : vector<8x128xf32>
    %c0_13 = arith.constant 0 : index
    %c0_14 = arith.constant 0 : index
    %12 = vector.load %arg4[%c0_13, %c0_14] : memref<128x128xf32, #tpu.memory_space<vmem>>, vector<128x128xf32>
    %cst_15 = arith.constant dense<0.000000e+00> : vector<8x128xf32>
    %13 = tpu.matmul %11, %12, %cst_15 {dimension_numbers = #tpu.dot_dimension_numbers<[1], [0], [0], [1], [0, 0, 1, 1], [], []>} : vector<8x128xf32>, vector<128x128xf32>, vector<8x128xf32> -> vector<8x128xf32>
    %c0_16 = arith.constant 0 : index
    %c0_17 = arith.constant 0 : index
    %14 = vector.load %arg5[%c0_16, %c0_17] : memref<1x128xf32, #tpu.memory_space<vmem>>, vector<1x128xf32>
    %15 = vector.broadcast %14 : vector<1x128xf32> to vector<8x128xf32>
    %16 = arith.addf %13, %15 : vector<8x128xf32>
    %cst_18 = arith.constant 0.000000e+00 : f32
    %17 = vector.broadcast %cst_18 : f32 to vector<8x128xf32>
    %18 = arith.maximumf %16, %17 : vector<8x128xf32>
    %c0_19 = arith.constant 0 : index
    %c0_20 = arith.constant 0 : index
    %19 = vector.load %arg6[%c0_19, %c0_20] : memref<128x128xf32, #tpu.memory_space<vmem>>, vector<128x128xf32>
    %cst_21 = arith.constant dense<0.000000e+00> : vector<8x128xf32>
    %20 = tpu.matmul %18, %19, %cst_21 {dimension_numbers = #tpu.dot_dimension_numbers<[1], [0], [0], [1], [0, 0, 1, 1], [], []>} : vector<8x128xf32>, vector<128x128xf32>, vector<8x128xf32> -> vector<8x128xf32>
    %c0_22 = arith.constant 0 : index
    %c0_23 = arith.constant 0 : index
    %21 = vector.load %arg7[%c0_22, %c0_23] : memref<1x128xf32, #tpu.memory_space<vmem>>, vector<1x128xf32>
    %22 = vector.broadcast %21 : vector<1x128xf32> to vector<8x128xf32>
    %23 = arith.addf %20, %22 : vector<8x128xf32>
    %cst_24 = arith.constant 0.000000e+00 : f32
    %24 = vector.broadcast %cst_24 : f32 to vector<8x128xf32>
    %25 = arith.maximumf %23, %24 : vector<8x128xf32>
    %c0_25 = arith.constant 0 : index
    %c0_26 = arith.constant 0 : index
    %26 = vector.load %arg8[%c0_25, %c0_26] : memref<128x128xf32, #tpu.memory_space<vmem>>, vector<128x128xf32>
    %cst_27 = arith.constant dense<0.000000e+00> : vector<8x128xf32>
    %27 = tpu.matmul %25, %26, %cst_27 {dimension_numbers = #tpu.dot_dimension_numbers<[1], [0], [0], [1], [0, 0, 1, 1], [], []>} : vector<8x128xf32>, vector<128x128xf32>, vector<8x128xf32> -> vector<8x128xf32>
    %c0_28 = arith.constant 0 : index
    %c0_29 = arith.constant 0 : index
    %28 = vector.load %arg9[%c0_28, %c0_29] : memref<1x128xf32, #tpu.memory_space<vmem>>, vector<1x128xf32>
    %29 = vector.broadcast %28 : vector<1x128xf32> to vector<8x128xf32>
    %30 = arith.addf %27, %29 : vector<8x128xf32>
    %cst_30 = arith.constant 0.000000e+00 : f32
    %31 = vector.broadcast %cst_30 : f32 to vector<8x128xf32>
    %32 = arith.maximumf %30, %31 : vector<8x128xf32>
    %c0_31 = arith.constant 0 : index
    %c0_32 = arith.constant 0 : index
    %33 = vector.load %arg10[%c0_31, %c0_32] : memref<128x128xf32, #tpu.memory_space<vmem>>, vector<128x128xf32>
    %cst_33 = arith.constant dense<0.000000e+00> : vector<8x128xf32>
    %34 = tpu.matmul %32, %33, %cst_33 {dimension_numbers = #tpu.dot_dimension_numbers<[1], [0], [0], [1], [0, 0, 1, 1], [], []>} : vector<8x128xf32>, vector<128x128xf32>, vector<8x128xf32> -> vector<8x128xf32>
    %c0_34 = arith.constant 0 : index
    %c0_35 = arith.constant 0 : index
    %35 = vector.load %arg11[%c0_34, %c0_35] : memref<1x128xf32, #tpu.memory_space<vmem>>, vector<1x128xf32>
    %36 = vector.broadcast %35 : vector<1x128xf32> to vector<8x128xf32>
    %37 = arith.addf %34, %36 : vector<8x128xf32>
    %cst_36 = arith.constant 0.000000e+00 : f32
    %38 = vector.broadcast %cst_36 : f32 to vector<8x128xf32>
    %39 = arith.maximumf %37, %38 : vector<8x128xf32>
    %c0_37 = arith.constant 0 : index
    %c0_38 = arith.constant 0 : index
    %40 = vector.load %arg12[%c0_37, %c0_38] : memref<128x128xf32, #tpu.memory_space<vmem>>, vector<128x128xf32>
    %cst_39 = arith.constant dense<0.000000e+00> : vector<8x128xf32>
    %41 = tpu.matmul %39, %40, %cst_39 {dimension_numbers = #tpu.dot_dimension_numbers<[1], [0], [0], [1], [0, 0, 1, 1], [], []>} : vector<8x128xf32>, vector<128x128xf32>, vector<8x128xf32> -> vector<8x128xf32>
    %c0_40 = arith.constant 0 : index
    %c0_41 = arith.constant 0 : index
    %42 = vector.load %arg13[%c0_40, %c0_41] : memref<1x128xf32, #tpu.memory_space<vmem>>, vector<1x128xf32>
    %43 = vector.broadcast %42 : vector<1x128xf32> to vector<8x128xf32>
    %44 = arith.addf %41, %43 : vector<8x128xf32>
    %cst_42 = arith.constant 0.000000e+00 : f32
    %45 = vector.broadcast %cst_42 : f32 to vector<8x128xf32>
    %46 = arith.maximumf %44, %45 : vector<8x128xf32>
    %c0_43 = arith.constant 0 : index
    %c0_44 = arith.constant 0 : index
    %47 = vector.load %arg14[%c0_43, %c0_44] : memref<128x128xf32, #tpu.memory_space<vmem>>, vector<128x128xf32>
    %cst_45 = arith.constant dense<0.000000e+00> : vector<8x128xf32>
    %48 = tpu.matmul %46, %47, %cst_45 {dimension_numbers = #tpu.dot_dimension_numbers<[1], [0], [0], [1], [0, 0, 1, 1], [], []>} : vector<8x128xf32>, vector<128x128xf32>, vector<8x128xf32> -> vector<8x128xf32>
    %c0_46 = arith.constant 0 : index
    %c0_47 = arith.constant 0 : index
    %49 = vector.load %arg15[%c0_46, %c0_47] : memref<1x128xf32, #tpu.memory_space<vmem>>, vector<1x128xf32>
    %50 = vector.broadcast %49 : vector<1x128xf32> to vector<8x128xf32>
    %51 = arith.addf %48, %50 : vector<8x128xf32>
    %52 = vector.extract_strided_slice %51 {offsets = [0, 0], sizes = [8, 6], strides = [1, 1]} : vector<8x128xf32> to vector<8x6xf32>
    %c0_48 = arith.constant 0 : index
    %c0_49 = arith.constant 0 : index
    %53 = vector.load %arg16[%c0_48, %c0_49] : memref<8x6xf32, #tpu.memory_space<vmem>>, vector<8x6xf32>
    tpu.vector_store %arg16[%c0_48, %c0_49], %52 {strides = array<i32>} : memref<8x6xf32, #tpu.memory_space<vmem>>, vector<8x6xf32>,
    return
  }
  func.func @transform_0(%arg0: i32) -> (i32, i32) {
    %c0_i32 = arith.constant 0 : i32
    %c0_i32_0 = arith.constant 0 : i32
    return %arg0, %c0_i32 : i32, i32
  }
  func.func @transform_1(%arg0: i32) -> (i32, i32) {
    %c0_i32 = arith.constant 0 : i32
    %c0_i32_0 = arith.constant 0 : i32
    %c0_i32_1 = arith.constant 0 : i32
    return %c0_i32, %c0_i32_0 : i32, i32
  }
  func.func @transform_2(%arg0: i32) -> (i32, i32) {
    %c0_i32 = arith.constant 0 : i32
    %c0_i32_0 = arith.constant 0 : i32
    %c0_i32_1 = arith.constant 0 : i32
    return %c0_i32, %c0_i32_0 : i32, i32
  }
  func.func @transform_3(%arg0: i32) -> (i32, i32) {
    %c0_i32 = arith.constant 0 : i32
    %c0_i32_0 = arith.constant 0 : i32
    %c0_i32_1 = arith.constant 0 : i32
    return %c0_i32, %c0_i32_0 : i32, i32
  }
  func.func @transform_4(%arg0: i32) -> (i32, i32) {
    %c0_i32 = arith.constant 0 : i32
    %c0_i32_0 = arith.constant 0 : i32
    %c0_i32_1 = arith.constant 0 : i32
    return %c0_i32, %c0_i32_0 : i32, i32
  }
  func.func @transform_5(%arg0: i32) -> (i32, i32) {
    %c0_i32 = arith.constant 0 : i32
    %c0_i32_0 = arith.constant 0 : i32
    %c0_i32_1 = arith.constant 0 : i32
    return %c0_i32, %c0_i32_0 : i32, i32
  }
  func.func @transform_6(%arg0: i32) -> (i32, i32) {
    %c0_i32 = arith.constant 0 : i32
    %c0_i32_0 = arith.constant 0 : i32
    %c0_i32_1 = arith.constant 0 : i32
    return %c0_i32, %c0_i32_0 : i32, i32
  }
  func.func @transform_7(%arg0: i32) -> (i32, i32) {
    %c0_i32 = arith.constant 0 : i32
    %c0_i32_0 = arith.constant 0 : i32
    %c0_i32_1 = arith.constant 0 : i32
    return %c0_i32, %c0_i32_0 : i32, i32
  }
  func.func @transform_8(%arg0: i32) -> (i32, i32) {
    %c0_i32 = arith.constant 0 : i32
    %c0_i32_0 = arith.constant 0 : i32
    %c0_i32_1 = arith.constant 0 : i32
    return %c0_i32, %c0_i32_0 : i32, i32
  }
  func.func @transform_9(%arg0: i32) -> (i32, i32) {
    %c0_i32 = arith.constant 0 : i32
    %c0_i32_0 = arith.constant 0 : i32
    %c0_i32_1 = arith.constant 0 : i32
    return %c0_i32, %c0_i32_0 : i32, i32
  }
  func.func @transform_10(%arg0: i32) -> (i32, i32) {
    %c0_i32 = arith.constant 0 : i32
    %c0_i32_0 = arith.constant 0 : i32
    %c0_i32_1 = arith.constant 0 : i32
    return %c0_i32, %c0_i32_0 : i32, i32
  }
  func.func @transform_11(%arg0: i32) -> (i32, i32) {
    %c0_i32 = arith.constant 0 : i32
    %c0_i32_0 = arith.constant 0 : i32
    %c0_i32_1 = arith.constant 0 : i32
    return %c0_i32, %c0_i32_0 : i32, i32
  }
  func.func @transform_12(%arg0: i32) -> (i32, i32) {
    %c0_i32 = arith.constant 0 : i32
    %c0_i32_0 = arith.constant 0 : i32
    %c0_i32_1 = arith.constant 0 : i32
    return %c0_i32, %c0_i32_0 : i32, i32
  }
  func.func @transform_13(%arg0: i32) -> (i32, i32) {
    %c0_i32 = arith.constant 0 : i32
    %c0_i32_0 = arith.constant 0 : i32
    %c0_i32_1 = arith.constant 0 : i32
    return %c0_i32, %c0_i32_0 : i32, i32
  }
  func.func @transform_14(%arg0: i32) -> (i32, i32) {
    %c0_i32 = arith.constant 0 : i32
    %c0_i32_0 = arith.constant 0 : i32
    %c0_i32_1 = arith.constant 0 : i32
    return %c0_i32, %c0_i32_0 : i32, i32
  }
  func.func @transform_15(%arg0: i32) -> (i32, i32) {
    %c0_i32 = arith.constant 0 : i32
    %c0_i32_0 = arith.constant 0 : i32
    return %arg0, %c0_i32 : i32, i32
  }
}

</mosaic_0001>

<bundles_post_ra>
// kernel: mlp_forward.1
= control target key start
LH: loop header
LB: loop body
LE: loop exit
PB: predicated region body
PF: predicated region fallthrough
CT: control target
= control target key end

     0   :  { %v1125_v1 = vmov 0.0   ;;  %vm1126_vm0 = vmmov 0   ;;  %vm53_vm1 = vcmask 97280   ;;  %s1698_s0 = inlined_call_operand.vmem [shape: f32[8,12], index: 0, kind: input, shape index: {}]   ;;  %s1699_s1 = inlined_call_operand.vmem [shape: f32[128,128], index: 1, kind: input, shape index: {}]   ;;  %s1700_s2 = inlined_call_operand.vmem [shape: f32[1,128], index: 2, kind: input, shape index: {}]   ;;  %s1701_s3 = inlined_call_operand.vmem [shape: f32[128,128], index: 3, kind: input, shape index: {}]   ;;  %s1702_s4 = inlined_call_operand.vmem [shape: f32[1,128], index: 4, kind: input, shape index: {}]   ;;  %s1703_s5 = inlined_call_operand.vmem [shape: f32[128,128], index: 5, kind: input, shape index: {}]   ;;  %s1704_s6 = inlined_call_operand.vmem [shape: f32[1,128], index: 6, kind: input, shape index: {}]   ;;  %s1705_s7 = inlined_call_operand.vmem [shape: f32[128,128], index: 7, kind: input, shape index: {}]   ;;  %s1706_s8 = inlined_call_operand.vmem [shape: f32[1,128], index: 8, kind: input, shape index: {}]   ;;  %s1707_s9 = inlined_call_operand.vmem [shape: f32[128,128], index: 9, kind: input, shape index: {}]   ;;  %s1708_s10 = inlined_call_operand.vmem [shape: f32[1,128], index: 10, kind: input, shape index: {}]   ;;  %s1709_s11 = inlined_call_operand.vmem [shape: f32[128,128], index: 11, kind: input, shape index: {}]   ;;  %s1710_s12 = inlined_call_operand.vmem [shape: f32[1,128], index: 12, kind: input, shape index: {}]   ;;  %s1711_s13 = inlined_call_operand.vmem [shape: f32[128,128], index: 13, kind: input, shape index: {}]   ;;  %s1712_s14 = inlined_call_operand.vmem [shape: f32[1,128], index: 14, kind: input, shape index: {}]   ;;  %s1713_s15 = inlined_call_operand.hbm [shape: f32[8,6], index: 15, kind: output, shape index: {}]  }
   0x1   :  { %v71_v0 = vld [vmem:[%s1699_s1 + $0x78] sm:$0xff]  ;;  %855 = vmatprep.subr.mxu0 %v1125_v1  ;;  %51 = vst [vmem:[#allocation2] sm:$0xff] %v1125_v1  ;;  %v70_v2 = vld [vmem:[%s1699_s1 + $0x70] sm:$0xff]  ;;  %887 = vmatprep.mubr.msk.f32.mxu0 %vm1126_vm0, %v1125_v1  ;;  %v69_v3 = vld [vmem:[%s1699_s1 + $0x68] sm:$0xff] }
   0x2   :  { %856 = vmatpush3.msra.mxu0 %v71_v0  ;;  %890 = vmatprep.subr.mxu1 %v1125_v1  ;;  %v68_v4 = vld [vmem:[%s1699_s1 + $0x60] sm:$0xff]  ;;  %v165_v6 = vld [vmem:[%s1701_s3 + $0x78] sm:$0xff]  ;;  %v164_v7 = vld [vmem:[%s1701_s3 + $0x70] sm:$0xff] }
   0x3   :  { %857 = vmatprep.subr.mxu0 %v1125_v1  ;;  %922 = vmatprep.mubr.msk.f32.mxu1 %vm1126_vm0, %v1125_v1  ;;  %v52_v5 = vld [vmem:[%s1698_s0] sm:$0xff]  ;;  %v67_v8 = vld [vmem:[%s1699_s1 + $0x58] sm:$0xff]  ;;  %v163_v9 = vld [vmem:[%s1701_s3 + $0x68] sm:$0xff] }
   0x4   :  { %858 = vmatpush3.msra.mxu0 %v70_v2  ;;  %54 = vst.msk [vmem:[#allocation2] sm:$0xff] %vm53_vm1, %v52_v5  ;;  %891 = vmatpush3.msra.mxu1 %v165_v6  ;;  %v66_v10 = vld [vmem:[%s1699_s1 + $0x50] sm:$0xff]  ;;  %v162_v11 = vld [vmem:[%s1701_s3 + $0x60] sm:$0xff] }
   0x5   :  { %859 = vmatprep.subr.mxu0 %v1125_v1  ;;  %892 = vmatprep.subr.mxu1 %v1125_v1 }
   0x6   :  { %860 = vmatpush3.msra.mxu0 %v69_v3  ;;  %893 = vmatpush3.msra.mxu1 %v164_v7 }
   0x7   :  { %861 = vmatprep.subr.mxu0 %v1125_v1  ;;  %894 = vmatprep.subr.mxu1 %v1125_v1 }
   0x8   :  { %862 = vmatpush3.msra.mxu0 %v68_v4  ;;  %895 = vmatpush3.msra.mxu1 %v163_v9 }
   0x9   :  { %863 = vmatprep.subr.mxu0 %v1125_v1 }
   0xa   :  { %864 = vmatpush3.msra.mxu0 %v67_v8 }
   0xb   :  { %20 = vsyncpa [#allocation4], 0  ;;  %865 = vmatprep.subr.mxu0 %v1125_v1  ;;  %v65_v12 = vld [vmem:[%s1699_s1 + $0x48] sm:$0xff]  ;;  %896 = vmatprep.subr.mxu1 %v1125_v1  ;;  %v161_v13 = vld [vmem:[%s1701_s3 + $0x58] sm:$0xff]  ;;  %vm713_vm2 = vcmask 48128  }
   0xc   :  { %866 = vmatpush3.msra.mxu0 %v66_v10  ;;  %897 = vmatpush3.msra.mxu1 %v162_v11  ;;  %v64_v14 = vld [vmem:[%s1699_s1 + $0x40] sm:$0xff]  ;;  %v160_v15 = vld [vmem:[%s1701_s3 + $0x50] sm:$0xff]  ;;  %v63_v16 = vld [vmem:[%s1699_s1 + $0x38] sm:$0xff] }
   0xd   :  { %867 = vmatprep.subr.mxu0 %v1125_v1  ;;  %898 = vmatprep.subr.mxu1 %v1125_v1  ;;  %v159_v17 = vld [vmem:[%s1701_s3 + $0x48] sm:$0xff]  ;;  %v62_v18 = vld [vmem:[%s1699_s1 + $0x30] sm:$0xff]  ;;  %v158_v19 = vld [vmem:[%s1701_s3 + $0x40] sm:$0xff] }
   0xe   :  { %868 = vmatpush3.msra.mxu0 %v65_v12  ;;  %899 = vmatpush3.msra.mxu1 %v161_v13  ;;  %v61_v20 = vld [vmem:[%s1699_s1 + $0x28] sm:$0xff]  ;;  %v157_v21 = vld [vmem:[%s1701_s3 + $0x38] sm:$0xff]  ;;  %v60_v22 = vld [vmem:[%s1699_s1 + $0x20] sm:$0xff] }
   0xf   :  { %869 = vmatprep.subr.mxu0 %v1125_v1  ;;  %900 = vmatprep.subr.mxu1 %v1125_v1  ;;  %v156_v23 = vld [vmem:[%s1701_s3 + $0x30] sm:$0xff]  ;;  %v59_v24 = vld [vmem:[%s1699_s1 + $0x18] sm:$0xff]  ;;  %v155_v25 = vld [vmem:[%s1701_s3 + $0x28] sm:$0xff] }
  0x10   :  { %870 = vmatpush3.msra.mxu0 %v64_v14  ;;  %901 = vmatpush3.msra.mxu1 %v160_v15  ;;  %v58_v26 = vld [vmem:[%s1699_s1 + $0x10] sm:$0xff]  ;;  %v154_v27 = vld [vmem:[%s1701_s3 + $0x20] sm:$0xff]  ;;  %v57_v28 = vld [vmem:[%s1699_s1 + $0x8] sm:$0xff] }
  0x11   :  { %871 = vmatprep.subr.mxu0 %v1125_v1  ;;  %902 = vmatprep.subr.mxu1 %v1125_v1  ;;  %v153_v29 = vld [vmem:[%s1701_s3 + $0x18] sm:$0xff]  ;;  %v56_v30 = vld [vmem:[%s1699_s1] sm:$0xff]  ;;  %v152_v32 = vld [vmem:[%s1701_s3 + $0x10] sm:$0xff]  ;;  %s1127_s1 = smov [#allocation3]  }
  0x12   :  { %872 = vmatpush3.msra.mxu0 %v63_v16  ;;  %903 = vmatpush3.msra.mxu1 %v159_v17  ;;  %v55_v31 = vld [vmem:[#allocation2] sm:$0xff]  ;;  %v151_v33 = vld [vmem:[%s1701_s3 + $0x8] sm:$0xff]  ;;  %v259_v35 = vld [vmem:[%s1703_s5 + $0x78] sm:$0xff]  ;;  %s721_s17 = sshll.u32 %s1127_s1, 4  ;;  %s722_s17 = int_to_ptr.vmem [resolvable:$true] %s721_s17 }
  0x13   :  { %873 = vmatprep.subr.mxu0 %v1125_v1  ;;  %904 = vmatprep.subr.mxu1 %v1125_v1  ;;  %v150_v34 = vld [vmem:[%s1701_s3] sm:$0xff]  ;;  %v258_v36 = vld [vmem:[%s1703_s5 + $0x70] sm:$0xff]  ;;  %v257_v37 = vld [vmem:[%s1703_s5 + $0x68] sm:$0xff]  ;;  %p1108_p1 = scmp.lt.s32.totalorder %s722_s17, %s722_s17 }
  0x14   :  { %874 = vmatpush3.msra.mxu0 %v62_v18  ;;  %905 = vmatpush3.msra.mxu1 %v158_v19  ;;  %v256_v38 = vld [vmem:[%s1703_s5 + $0x60] sm:$0xff]  ;;  %v255_v39 = vld [vmem:[%s1703_s5 + $0x58] sm:$0xff]  ;;  %v254_v40 = vld [vmem:[%s1703_s5 + $0x50] sm:$0xff] }
  0x15   :  { %875 = vmatprep.subr.mxu0 %v1125_v1  ;;  %906 = vmatprep.subr.mxu1 %v1125_v1  ;;  %v253_v41 = vld [vmem:[%s1703_s5 + $0x48] sm:$0xff]  ;;  %v252_v42 = vld [vmem:[%s1703_s5 + $0x40] sm:$0xff]  ;;  %v251_v43 = vld [vmem:[%s1703_s5 + $0x38] sm:$0xff] }
  0x16   :  { %876 = vmatpush3.msra.mxu0 %v61_v20  ;;  %907 = vmatpush3.msra.mxu1 %v157_v21  ;;  %v250_v44 = vld [vmem:[%s1703_s5 + $0x30] sm:$0xff]  ;;  %v249_v45 = vld [vmem:[%s1703_s5 + $0x28] sm:$0xff]  ;;  %v248_v46 = vld [vmem:[%s1703_s5 + $0x20] sm:$0xff] }
  0x17   :  { %877 = vmatprep.subr.mxu0 %v1125_v1  ;;  %908 = vmatprep.subr.mxu1 %v1125_v1  ;;  %v247_v47 = vld [vmem:[%s1703_s5 + $0x18] sm:$0xff]  ;;  %v729_v48 = vld [vmem:[%s1700_s2] ss:$0 sm:$0xff]  ;;  %v246_v53 = vld [vmem:[%s1703_s5 + $0x10] sm:$0xff] }
  0x18   :  { %878 = vmatpush3.msra.mxu0 %v60_v22  ;;  %909 = vmatpush3.msra.mxu1 %v156_v23  ;;  %v245_v54 = vld [vmem:[%s1703_s5 + $0x8] sm:$0xff]  ;;  %v244_v55 = vld [vmem:[%s1703_s5] sm:$0xff]  ;;  %v353_v56 = vld [vmem:[%s1705_s7 + $0x78] sm:$0xff] }
  0x19   :  { %879 = vmatprep.subr.mxu0 %v1125_v1  ;;  %910 = vmatprep.subr.mxu1 %v1125_v1  ;;  %v352_v57 = vld [vmem:[%s1705_s7 + $0x70] sm:$0xff]  ;;  %v351_v58 = vld [vmem:[%s1705_s7 + $0x68] sm:$0xff]  ;;  %v350_v59 = vld [vmem:[%s1705_s7 + $0x60] sm:$0xff] }
  0x1a   :  { %880 = vmatpush3.msra.mxu0 %v59_v24  ;;  %911 = vmatpush3.msra.mxu1 %v155_v25  ;;  %v349_v60 = vld [vmem:[%s1705_s7 + $0x58] sm:$0xff]  ;;  %v348_v61 = vld [vmem:[%s1705_s7 + $0x50] sm:$0xff]  ;;  %v347_v62 = vld [vmem:[%s1705_s7 + $0x48] sm:$0xff] }
  0x1b   :  { %881 = vmatprep.subr.mxu0 %v1125_v1  ;;  %912 = vmatprep.subr.mxu1 %v1125_v1  ;;  %v346_v63 = vld [vmem:[%s1705_s7 + $0x40] sm:$0xff]  ;;  %v345_v0 = vld [vmem:[%s1705_s7 + $0x38] sm:$0xff]  ;;  %v344_v2 = vld [vmem:[%s1705_s7 + $0x30] sm:$0xff] }
  0x1c   :  { %882 = vmatpush3.msra.mxu0 %v58_v26  ;;  %913 = vmatpush3.msra.mxu1 %v154_v27  ;;  %v343_v3 = vld [vmem:[%s1705_s7 + $0x28] sm:$0xff]  ;;  %v342_v4 = vld [vmem:[%s1705_s7 + $0x20] sm:$0xff]  ;;  %v341_v5 = vld [vmem:[%s1705_s7 + $0x18] sm:$0xff] }
  0x1d   :  { %883 = vmatprep.subr.mxu0 %v1125_v1  ;;  %914 = vmatprep.subr.mxu1 %v1125_v1  ;;  %v730_v6 = vld [vmem:[%s1702_s4] ss:$0 sm:$0xff]  ;;  %v340_v11 = vld [vmem:[%s1705_s7 + $0x10] sm:$0xff]  ;;  %v339_v12 = vld [vmem:[%s1705_s7 + $0x8] sm:$0xff] }
  0x1e   :  { %884 = vmatpush3.msra.mxu0 %v57_v28  ;;  %915 = vmatpush3.msra.mxu1 %v153_v29  ;;  %v338_v13 = vld [vmem:[%s1705_s7] sm:$0xff]  ;;  %v447_v14 = vld [vmem:[%s1707_s9 + $0x78] sm:$0xff]  ;;  %v446_v15 = vld [vmem:[%s1707_s9 + $0x70] sm:$0xff] }
  0x1f   :  { %885 = vmatprep.subr.mxu0 %v1125_v1  ;;  %916 = vmatprep.subr.mxu1 %v1125_v1  ;;  %v445_v16 = vld [vmem:[%s1707_s9 + $0x68] sm:$0xff]  ;;  %v444_v17 = vld [vmem:[%s1707_s9 + $0x60] sm:$0xff]  ;;  %v443_v18 = vld [vmem:[%s1707_s9 + $0x58] sm:$0xff] }
  0x20   :  { %886 = vmatpush3.msra.mxu0 %v56_v30  ;;  %917 = vmatpush3.msra.mxu1 %v152_v32  ;;  %v442_v19 = vld [vmem:[%s1707_s9 + $0x50] sm:$0xff]  ;;  %v441_v20 = vld [vmem:[%s1707_s9 + $0x48] sm:$0xff]  ;;  %v440_v21 = vld [vmem:[%s1707_s9 + $0x40] sm:$0xff] }
  0x21   :  { %888 = vmatmul.mubr.f32.vlgmr.msra.gmra.mxu0 %v55_v31  ;;  %925 = vmatprep.subr.mxu0 %v1125_v1  ;;  %v439_v22 = vld [vmem:[%s1707_s9 + $0x38] sm:$0xff]  ;;  %v438_v23 = vld [vmem:[%s1707_s9 + $0x30] sm:$0xff]  ;;  %v437_v24 = vld [vmem:[%s1707_s9 + $0x28] sm:$0xff] }
  0x22   :  { %957 = vmatprep.mubr.msk.f32.mxu0 %vm1126_vm0, %v1125_v1  ;;  %918 = vmatprep.subr.mxu1 %v1125_v1  ;;  %v436_v25 = vld [vmem:[%s1707_s9 + $0x20] sm:$0xff]  ;;  %v435_v26 = vld [vmem:[%s1707_s9 + $0x18] sm:$0xff]  ;;  %v434_v32 = vld [vmem:[%s1707_s9 + $0x10] sm:$0xff] }
  0x23   :  { %919 = vmatpush3.msra.mxu1 %v151_v33  ;;  %926 = vmatpush3.msra.mxu0 %v259_v35  ;;  %v731_v27 = vld [vmem:[%s1704_s6] ss:$0 sm:$0xff]  ;;  %v433_v33 = vld [vmem:[%s1707_s9 + $0x8] sm:$0xff]  ;;  %v541_v35 = vld [vmem:[%s1709_s11 + $0x78] sm:$0xff] }
  0x24   :  { %920 = vmatprep.subr.mxu1 %v1125_v1  ;;  %927 = vmatprep.subr.mxu0 %v1125_v1 }
  0x25   :  { %921 = vmatpush3.msra.mxu1 %v150_v34  ;;  %928 = vmatpush3.msra.mxu0 %v258_v36  ;;  %v432_v34 = vld [vmem:[%s1707_s9] sm:$0xff]  ;;  %v540_v36 = vld [vmem:[%s1709_s11 + $0x70] sm:$0xff] }
  0x26   :  { %960 = vmatprep.subr.mxu1 %v1125_v1  ;;  %929 = vmatprep.subr.mxu0 %v1125_v1 }
  0x27   :  { %930 = vmatpush3.msra.mxu0 %v257_v37  ;;  %v539_v37 = vld [vmem:[%s1709_s11 + $0x68] sm:$0xff] }
  0x28   :  { %931 = vmatprep.subr.mxu0 %v1125_v1 }
  0x29   :  { %932 = vmatpush3.msra.mxu0 %v256_v38  ;;  %v538_v38 = vld [vmem:[%s1709_s11 + $0x60] sm:$0xff] }
  0x2a   :  { %933 = vmatprep.subr.mxu0 %v1125_v1 }
  0x2b   :  { %934 = vmatpush3.msra.mxu0 %v255_v39  ;;  %v537_v39 = vld [vmem:[%s1709_s11 + $0x58] sm:$0xff] }
  0x2c   :  { %935 = vmatprep.subr.mxu0 %v1125_v1 }
  0x2d   :  { %936 = vmatpush3.msra.mxu0 %v254_v40  ;;  %v536_v40 = vld [vmem:[%s1709_s11 + $0x50] sm:$0xff] }
  0x2e   :  { %937 = vmatprep.subr.mxu0 %v1125_v1 }
  0x2f   :  { %938 = vmatpush3.msra.mxu0 %v253_v41  ;;  %v535_v41 = vld [vmem:[%s1709_s11 + $0x48] sm:$0xff] }
  0x30   :  { %939 = vmatprep.subr.mxu0 %v1125_v1 }
  0x31   :  { %940 = vmatpush3.msra.mxu0 %v252_v42  ;;  %v534_v42 = vld [vmem:[%s1709_s11 + $0x40] sm:$0xff] }
  0x32   :  { %941 = vmatprep.subr.mxu0 %v1125_v1 }
  0x33   :  { %942 = vmatpush3.msra.mxu0 %v251_v43  ;;  %v533_v43 = vld [vmem:[%s1709_s11 + $0x38] sm:$0xff] }
  0x34   :  { %943 = vmatprep.subr.mxu0 %v1125_v1 }
  0x35   :  { %944 = vmatpush3.msra.mxu0 %v250_v44  ;;  %v532_v44 = vld [vmem:[%s1709_s11 + $0x30] sm:$0xff] }
  0x36   :  { %945 = vmatprep.subr.mxu0 %v1125_v1 }
  0x37   :  { %946 = vmatpush3.msra.mxu0 %v249_v45  ;;  %v531_v45 = vld [vmem:[%s1709_s11 + $0x28] sm:$0xff] }
  0x38   :  { %947 = vmatprep.subr.mxu0 %v1125_v1 }
  0x39   :  { %948 = vmatpush3.msra.mxu0 %v248_v46  ;;  %v530_v46 = vld [vmem:[%s1709_s11 + $0x20] sm:$0xff] }
  0x3a   :  { %949 = vmatprep.subr.mxu0 %v1125_v1 }
  0x3b   :  { %950 = vmatpush3.msra.mxu0 %v247_v47  ;;  %v529_v47 = vld [vmem:[%s1709_s11 + $0x18] sm:$0xff] }
  0x3c   :  { %951 = vmatprep.subr.mxu0 %v1125_v1 }
  0x3d   :  { %952 = vmatpush3.msra.mxu0 %v246_v53  ;;  %v528_v53 = vld [vmem:[%s1709_s11 + $0x10] sm:$0xff] }
  0x3e   :  { %953 = vmatprep.subr.mxu0 %v1125_v1 }
  0x3f   :  { %954 = vmatpush3.msra.mxu0 %v245_v54  ;;  %v527_v54 = vld [vmem:[%s1709_s11 + $0x8] sm:$0xff] }
  0x40   :  { %955 = vmatprep.subr.mxu0 %v1125_v1 }
  0x41   :  { %956 = vmatpush3.msra.mxu0 %v244_v55  ;;  %v526_v55 = vld [vmem:[%s1709_s11] sm:$0xff] }
  0x42   :  { %995 = vmatprep.subr.mxu0 %v1125_v1 }
  0xe1   :  { %v145_v49 = vpop.f32.mrf.mxu0 }
  0xe2   :  { %v146_v50 = vadd.f32 %v729_v48, %v145_v49  ;;  %v732_v48 = vld [vmem:[%s1706_s8] ss:$0 sm:$0xff] }
  0xe3   :  { %v889_v51 = vpop.f32.mrf.mxu0 }
  0xe4   :  { %v149_v52 = vmax.f32 %v146_v50, 0.0 }
  0xe6   :  { %923 = vmatmul.mubr.f32.vlgmr.msra.gmra.mxu1 %v149_v52 }
  0xe7   :  { %992 = vmatprep.mubr.msk.f32.mxu1 %vm1126_vm0, %v1125_v1  ;;  %961 = vmatpush3.msra.mxu1 %v353_v56  ;;  %v635_v56 = vld [vmem:[%s1711_s13 + $0x78] sm:$0xff] }
  0xe8   :  { %962 = vmatprep.subr.mxu1 %v1125_v1 }
  0xe9   :  { %963 = vmatpush3.msra.mxu1 %v352_v57  ;;  %v634_v57 = vld [vmem:[%s1711_s13 + $0x70] sm:$0xff] }
  0xea   :  { %964 = vmatprep.subr.mxu1 %v1125_v1 }
  0xeb   :  { %965 = vmatpush3.msra.mxu1 %v351_v58  ;;  %v633_v58 = vld [vmem:[%s1711_s13 + $0x68] sm:$0xff] }
  0xec   :  { %966 = vmatprep.subr.mxu1 %v1125_v1 }
  0xed   :  { %967 = vmatpush3.msra.mxu1 %v350_v59  ;;  %v632_v59 = vld [vmem:[%s1711_s13 + $0x60] sm:$0xff] }
  0xee   :  { %968 = vmatprep.subr.mxu1 %v1125_v1 }
  0xef   :  { %969 = vmatpush3.msra.mxu1 %v349_v60  ;;  %v631_v60 = vld [vmem:[%s1711_s13 + $0x58] sm:$0xff] }
  0xf0   :  { %970 = vmatprep.subr.mxu1 %v1125_v1 }
  0xf1   :  { %971 = vmatpush3.msra.mxu1 %v348_v61  ;;  %v630_v61 = vld [vmem:[%s1711_s13 + $0x50] sm:$0xff] }
  0xf2   :  { %972 = vmatprep.subr.mxu1 %v1125_v1 }
  0xf3   :  { %973 = vmatpush3.msra.mxu1 %v347_v62  ;;  %v629_v62 = vld [vmem:[%s1711_s13 + $0x48] sm:$0xff] }
  0xf4   :  { %974 = vmatprep.subr.mxu1 %v1125_v1 }
  0xf5   :  { %975 = vmatpush3.msra.mxu1 %v346_v63  ;;  %v628_v63 = vld [vmem:[%s1711_s13 + $0x40] sm:$0xff] }
  0xf6   :  { %976 = vmatprep.subr.mxu1 %v1125_v1 }
  0xf7   :  { %977 = vmatpush3.msra.mxu1 %v345_v0  ;;  %v627_v0 = vld [vmem:[%s1711_s13 + $0x38] sm:$0xff] }
  0xf8   :  { %978 = vmatprep.subr.mxu1 %v1125_v1 }
  0xf9   :  { %979 = vmatpush3.msra.mxu1 %v344_v2  ;;  %v626_v2 = vld [vmem:[%s1711_s13 + $0x30] sm:$0xff] }
  0xfa   :  { %980 = vmatprep.subr.mxu1 %v1125_v1 }
  0xfb   :  { %981 = vmatpush3.msra.mxu1 %v343_v3  ;;  %v625_v3 = vld [vmem:[%s1711_s13 + $0x28] sm:$0xff] }
  0xfc   :  { %982 = vmatprep.subr.mxu1 %v1125_v1 }
  0xfd   :  { %983 = vmatpush3.msra.mxu1 %v342_v4  ;;  %v624_v4 = vld [vmem:[%s1711_s13 + $0x20] sm:$0xff] }
  0xfe   :  { %984 = vmatprep.subr.mxu1 %v1125_v1 }
  0xff   :  { %985 = vmatpush3.msra.mxu1 %v341_v5  ;;  %v623_v5 = vld [vmem:[%s1711_s13 + $0x18] sm:$0xff] }
 0x100   :  { %986 = vmatprep.subr.mxu1 %v1125_v1 }
 0x101   :  { %987 = vmatpush3.msra.mxu1 %v340_v11  ;;  %v622_v11 = vld [vmem:[%s1711_s13 + $0x10] sm:$0xff] }
 0x102   :  { %988 = vmatprep.subr.mxu1 %v1125_v1 }
 0x103   :  { %989 = vmatpush3.msra.mxu1 %v339_v12  ;;  %v621_v12 = vld [vmem:[%s1711_s13 + $0x8] sm:$0xff] }
 0x104   :  { %990 = vmatprep.subr.mxu1 %v1125_v1 }
 0x105   :  { %991 = vmatpush3.msra.mxu1 %v338_v13  ;;  %v620_v13 = vld [vmem:[%s1711_s13] sm:$0xff]  ;;  %s1103_s13 = scalar_lea.vmem %s722_s17, 128 }
 0x106   :  { %1030 = vmatprep.subr.mxu1 %v1125_v1  ;;  %p1104_p0 = scmp.ne.s32.totalorder %s722_s17, %s1103_s13  ;;  %p1109_p2 = scmp.lt.s32.totalorder %s1103_s13, %s1103_s13 }
 0x108   :  { %p1110_p3 = por %p1109_p2, %p1108_p1 }
 0x10a   :  { %p1111_p4 = pnand %p1110_p3, %p1104_p0 }
 0x1a6   :  { %v239_v7 = vpop.f32.mrf.mxu1 }
 0x1a7   :  { %v240_v8 = vadd.f32 %v730_v6, %v239_v7  ;;  %v733_v6 = vld [vmem:[%s1708_s10] ss:$0 sm:$0xff] }
 0x1a8   :  { %v924_v9 = vpop.f32.mrf.mxu1 }
 0x1a9   :  { %v243_v10 = vmax.f32 %v240_v8, 0.0 }
 0x1ab   :  { %958 = vmatmul.mubr.f32.vlgmr.msra.gmra.mxu0 %v243_v10 }
 0x1ac   :  { %1027 = vmatprep.mubr.msk.f32.mxu0 %vm1126_vm0, %v1125_v1  ;;  %996 = vmatpush3.msra.mxu0 %v447_v14  ;;  %v734_v14 = vld [vmem:[%s1710_s12] ss:$0 sm:$0xff] }
 0x1ad   :  { %997 = vmatprep.subr.mxu0 %v1125_v1 }
 0x1ae   :  { %998 = vmatpush3.msra.mxu0 %v446_v15 }
 0x1af   :  { %999 = vmatprep.subr.mxu0 %v1125_v1 }
 0x1b0   :  { %1000 = vmatpush3.msra.mxu0 %v445_v16 }
 0x1b1   :  { %1001 = vmatprep.subr.mxu0 %v1125_v1 }
 0x1b2   :  { %1002 = vmatpush3.msra.mxu0 %v444_v17 }
 0x1b3   :  { %1003 = vmatprep.subr.mxu0 %v1125_v1 }
 0x1b4   :  { %1004 = vmatpush3.msra.mxu0 %v443_v18 }
 0x1b5   :  { %1005 = vmatprep.subr.mxu0 %v1125_v1 }
 0x1b6   :  { %1006 = vmatpush3.msra.mxu0 %v442_v19  ;;  %v735_v19 = vld [vmem:[%s1712_s14] ss:$0 sm:$0xff] }
 0x1b7   :  { %1007 = vmatprep.subr.mxu0 %v1125_v1 }
 0x1b8   :  { %1008 = vmatpush3.msra.mxu0 %v441_v20 }
 0x1b9   :  { %1009 = vmatprep.subr.mxu0 %v1125_v1 }
 0x1ba   :  { %1010 = vmatpush3.msra.mxu0 %v440_v21 }
 0x1bb   :  { %1011 = vmatprep.subr.mxu0 %v1125_v1 }
 0x1bc   :  { %1012 = vmatpush3.msra.mxu0 %v439_v22 }
 0x1bd   :  { %1013 = vmatprep.subr.mxu0 %v1125_v1 }
 0x1be   :  { %1014 = vmatpush3.msra.mxu0 %v438_v23 }
 0x1bf   :  { %1015 = vmatprep.subr.mxu0 %v1125_v1 }
 0x1c0   :  { %1016 = vmatpush3.msra.mxu0 %v437_v24 }
 0x1c1   :  { %1017 = vmatprep.subr.mxu0 %v1125_v1 }
 0x1c2   :  { %1018 = vmatpush3.msra.mxu0 %v436_v25 }
 0x1c3   :  { %1019 = vmatprep.subr.mxu0 %v1125_v1 }
 0x1c4   :  { %1020 = vmatpush3.msra.mxu0 %v435_v26 }
 0x1c5   :  { %1021 = vmatprep.subr.mxu0 %v1125_v1 }
 0x1c6   :  { %1022 = vmatpush3.msra.mxu0 %v434_v32 }
 0x1c7   :  { %1023 = vmatprep.subr.mxu0 %v1125_v1 }
 0x1c8   :  { %1024 = vmatpush3.msra.mxu0 %v433_v33 }
 0x1c9   :  { %1025 = vmatprep.subr.mxu0 %v1125_v1 }
 0x1ca   :  { %1026 = vmatpush3.msra.mxu0 %v432_v34 }
 0x1cb   :  { %1065 = vmatprep.subr.mxu0 %v1125_v1 }
 0x26b   :  { %v333_v28 = vpop.f32.mrf.mxu0 }
 0x26c   :  { %v334_v29 = vadd.f32 %v731_v27, %v333_v28 }
 0x26d   :  { %v959_v30 = vpop.f32.mrf.mxu0 }
 0x26e   :  { %v337_v31 = vmax.f32 %v334_v29, 0.0 }
 0x270   :  { %993 = vmatmul.mubr.f32.vlgmr.msra.gmra.mxu1 %v337_v31 }
 0x271   :  { %1062 = vmatprep.mubr.msk.f32.mxu1 %vm1126_vm0, %v1125_v1  ;;  %1031 = vmatpush3.msra.mxu1 %v541_v35 }
 0x272   :  { %1032 = vmatprep.subr.mxu1 %v1125_v1 }
 0x273   :  { %1033 = vmatpush3.msra.mxu1 %v540_v36 }
 0x274   :  { %1034 = vmatprep.subr.mxu1 %v1125_v1 }
 0x275   :  { %1035 = vmatpush3.msra.mxu1 %v539_v37 }
 0x276   :  { %1036 = vmatprep.subr.mxu1 %v1125_v1 }
 0x277   :  { %1037 = vmatpush3.msra.mxu1 %v538_v38 }
 0x278   :  { %1038 = vmatprep.subr.mxu1 %v1125_v1 }
 0x279   :  { %1039 = vmatpush3.msra.mxu1 %v537_v39 }
 0x27a   :  { %1040 = vmatprep.subr.mxu1 %v1125_v1 }
 0x27b   :  { %1041 = vmatpush3.msra.mxu1 %v536_v40 }
 0x27c   :  { %1042 = vmatprep.subr.mxu1 %v1125_v1 }
 0x27d   :  { %1043 = vmatpush3.msra.mxu1 %v535_v41 }
 0x27e   :  { %1044 = vmatprep.subr.mxu1 %v1125_v1 }
 0x27f   :  { %1045 = vmatpush3.msra.mxu1 %v534_v42 }
 0x280   :  { %1046 = vmatprep.subr.mxu1 %v1125_v1 }
 0x281   :  { %1047 = vmatpush3.msra.mxu1 %v533_v43 }
 0x282   :  { %1048 = vmatprep.subr.mxu1 %v1125_v1 }
 0x283   :  { %1049 = vmatpush3.msra.mxu1 %v532_v44 }
 0x284   :  { %1050 = vmatprep.subr.mxu1 %v1125_v1 }
 0x285   :  { %1051 = vmatpush3.msra.mxu1 %v531_v45 }
 0x286   :  { %1052 = vmatprep.subr.mxu1 %v1125_v1 }
 0x287   :  { %1053 = vmatpush3.msra.mxu1 %v530_v46 }
 0x288   :  { %1054 = vmatprep.subr.mxu1 %v1125_v1 }
 0x289   :  { %1055 = vmatpush3.msra.mxu1 %v529_v47 }
 0x28a   :  { %1056 = vmatprep.subr.mxu1 %v1125_v1 }
 0x28b   :  { %1057 = vmatpush3.msra.mxu1 %v528_v53 }
 0x28c   :  { %1058 = vmatprep.subr.mxu1 %v1125_v1 }
 0x28d   :  { %1059 = vmatpush3.msra.mxu1 %v527_v54 }
 0x28e   :  { %1060 = vmatprep.subr.mxu1 %v1125_v1 }
 0x28f   :  { %1061 = vmatpush3.msra.mxu1 %v526_v55 }
 0x330   :  { %v427_v49 = vpop.f32.mrf.mxu1 }
 0x331   :  { %v428_v50 = vadd.f32 %v732_v48, %v427_v49 }
 0x332   :  { %v994_v51 = vpop.f32.mrf.mxu1 }
 0x333   :  { %v431_v52 = vmax.f32 %v428_v50, 0.0 }
 0x335   :  { %1028 = vmatmul.mubr.f32.vlgmr.msra.gmra.mxu0 %v431_v52 }
 0x336   :  { %1097 = vmatprep.mubr.msk.f32.mxu0 %vm1126_vm0, %v1125_v1  ;;  %1066 = vmatpush3.msra.mxu0 %v635_v56 }
 0x337   :  { %1067 = vmatprep.subr.mxu0 %v1125_v1 }
 0x338   :  { %1068 = vmatpush3.msra.mxu0 %v634_v57 }
 0x339   :  { %1069 = vmatprep.subr.mxu0 %v1125_v1 }
 0x33a   :  { %1070 = vmatpush3.msra.mxu0 %v633_v58 }
 0x33b   :  { %1071 = vmatprep.subr.mxu0 %v1125_v1 }
 0x33c   :  { %1072 = vmatpush3.msra.mxu0 %v632_v59 }
 0x33d   :  { %1073 = vmatprep.subr.mxu0 %v1125_v1 }
 0x33e   :  { %1074 = vmatpush3.msra.mxu0 %v631_v60 }
 0x33f   :  { %1075 = vmatprep.subr.mxu0 %v1125_v1 }
 0x340   :  { %1076 = vmatpush3.msra.mxu0 %v630_v61 }
 0x341   :  { %1077 = vmatprep.subr.mxu0 %v1125_v1 }
 0x342   :  { %1078 = vmatpush3.msra.mxu0 %v629_v62 }
 0x343   :  { %1079 = vmatprep.subr.mxu0 %v1125_v1 }
 0x344   :  { %1080 = vmatpush3.msra.mxu0 %v628_v63 }
 0x345   :  { %1081 = vmatprep.subr.mxu0 %v1125_v1 }
 0x346   :  { %1082 = vmatpush3.msra.mxu0 %v627_v0 }
 0x347   :  { %1083 = vmatprep.subr.mxu0 %v1125_v1 }
 0x348   :  { %1084 = vmatpush3.msra.mxu0 %v626_v2 }
 0x349   :  { %1085 = vmatprep.subr.mxu0 %v1125_v1 }
 0x34a   :  { %1086 = vmatpush3.msra.mxu0 %v625_v3 }
 0x34b   :  { %1087 = vmatprep.subr.mxu0 %v1125_v1 }
 0x34c   :  { %1088 = vmatpush3.msra.mxu0 %v624_v4 }
 0x34d   :  { %1089 = vmatprep.subr.mxu0 %v1125_v1 }
 0x34e   :  { %1090 = vmatpush3.msra.mxu0 %v623_v5 }
 0x34f   :  { %1091 = vmatprep.subr.mxu0 %v1125_v1 }
 0x350   :  { %1092 = vmatpush3.msra.mxu0 %v622_v11 }
 0x351   :  { %1093 = vmatprep.subr.mxu0 %v1125_v1 }
 0x352   :  { %1094 = vmatpush3.msra.mxu0 %v621_v12 }
 0x353   :  { %1095 = vmatprep.subr.mxu0 %v1125_v1 }
 0x354   :  { %1096 = vmatpush3.msra.mxu0 %v620_v13 }
 0x3f5   :  { %v521_v7 = vpop.f32.mrf.mxu0 }
 0x3f6   :  { %v522_v8 = vadd.f32 %v733_v6, %v521_v7 }
 0x3f7   :  { %v1029_v9 = vpop.f32.mrf.mxu0 }
 0x3f8   :  { %v525_v10 = vmax.f32 %v522_v8, 0.0 }
 0x3fa   :  { %1063 = vmatmul.mubr.f32.vlgmr.msra.gmra.mxu1 %v525_v10 }
 0x4ba   :  { %v615_v15 = vpop.f32.mrf.mxu1 }
 0x4bb   :  { %v616_v16 = vadd.f32 %v734_v14, %v615_v15 }
 0x4bc   :  { %v1064_v17 = vpop.f32.mrf.mxu1 }
 0x4bd   :  { %v619_v18 = vmax.f32 %v616_v16, 0.0 }
 0x4bf   :  { %1098 = vmatmul.mubr.f32.vlgmr.msra.gmra.mxu0 %v619_v18 }
 0x57f   :  { %v709_v1 = vpop.f32.mrf.mxu0 }
 0x580   :  { %v710_v20 = vadd.f32 %v735_v19, %v709_v1 }
 0x581   :  { %v1099_v21 = vpop.f32.mrf.mxu0 }
 0x582   :  { %714 = vst.msk [vmem:[#allocation3] sm:$0xff] %vm713_vm2, %v710_v20 }
 0x583   :  { %1114 = shalt.err (!%p1111_p4)
}
 0x584   :  { %724 = dma.vmem_to_hbm [thread:$0]  %s722_s17, 128, %s1713_s15, [#allocation4]  }
 0x585   :  { %1123 = dma.done.wait [#allocation4], 128  }
 0x586   :  { %1124 = vsyncadd [#allocation4], 4294967168 }
 0x587   :  { %728 = vsyncpa [#allocation4], 1 }

</bundles_post_ra>
